<compile_context>
chip_gen: v7x
topology: tpu7x:2x2x1
jax: 0.10.0
libtpu: 0.0.40
codegen_flags: <defaults>
</compile_context>

<pallas_src>
import functools

import jax
import jax.numpy as jnp
from jax.experimental import pallas as pl
from jax.experimental.pallas import tpu as pltpu


_LANE = 128
_SUBLANE_BYTES = 32        # native sublane packing: 32 // itemsize rows
_F32_TEMP_BYTES = 20       # ~5 f32 full-tile temporaries / element (upcast, exp, iota, select)
_ROWVEC_BYTES = 512        # a (tn, 1) 32-bit column in VMEM is lane-padded to 128 -> 512 B/row


def _round_up(x: int, m: int) -> int:
    return ((x + m - 1) // m) * m


def _vmem_capacity_bytes() -> int:
    try:
        return int(pltpu.get_tpu_info().vmem_capacity_bytes)
    except Exception:
        return 64 * 1024 * 1024   # conservative default (v7x per-core VMEM)


def _ce_loss_kernel(logits_ref, target_ref, out_ref, *row_state,
                    n_rows, n_cols, tile_rows, tile_cols,
                    row_tiles_per_part, n_col_tiles):
    """One (partial, row-tile, class-tile) grid step of CrossEntropyLoss(sum)."""
    p = pl.program_id(0)   # partial-sum id ("parallel": one per TensorCore on v7x)
    i = pl.program_id(1)   # row tile within this partial ("arbitrary")
    j = pl.program_id(2)   # class tile ("arbitrary", fastest axis)

    # Zero this partial's resident accumulator block at the start of its sweep.
    @pl.when(jnp.logical_and(i == 0, j == 0))
    def _zero_partial():
        out_ref[...] = jnp.zeros_like(out_ref)

    # Unclamped row-tile index: duplicate (DMA-clamped) tiles mask out fully below.
    row_tile = p * row_tiles_per_part + i

    x = logits_ref[...].astype(jnp.float32)     # (tn, tc) native dtype -> f32 math
    t = target_ref[...]                         # (tn, 1) int32 class ids

    cls_idx = tile_cols * j + jax.lax.broadcasted_iota(jnp.int32, x.shape, 1)
    if n_cols % tile_cols != 0:
        # Ragged class edge: keep garbage lanes out of the max / exp-sum.
        x_lse = jnp.where(cls_idx < n_cols, x, -jnp.inf)
    else:
        x_lse = x

    # Target-logit gather on the RAW logits (decoupled from the max/shift pass).
    tgt_part = jnp.sum(jnp.where(cls_idx == t, x, 0.0), axis=-1, keepdims=True)
    tile_max = jnp.max(x_lse, axis=-1, keepdims=True)

    def _accumulate(per_example):
        row_id = row_tile * tile_rows + jax.lax.broadcasted_iota(
            jnp.int32, per_example.shape, 0)
        # Select-style mask: padded / duplicate rows may hold NaN or Inf.
        masked = jnp.where(row_id < n_rows, per_example, 0.0)
        out_ref[...] += jnp.sum(masked)          # VMEM-resident block, no SMEM hop

    if n_col_tiles == 1:
        # Whole class axis fits one tile: single fused pass.
        sum_exp = jnp.sum(jnp.exp(x_lse - tile_max), axis=-1, keepdims=True)
        _accumulate(tile_max + jnp.log(sum_exp) - tgt_part)
    else:
        # Vocab-scale C: online logsumexp across class tiles, per-row state in VMEM.
        m_ref, l_ref, t_ref = row_state

        @pl.when(j == 0)
        def _init_row_state():
            m_ref[...] = jnp.full_like(m_ref, -jnp.inf)
            l_ref[...] = jnp.zeros_like(l_ref)
            t_ref[...] = jnp.zeros_like(t_ref)

        m_prev = m_ref[...]
        m_new = jnp.maximum(m_prev, tile_max)
        l_ref[...] = l_ref[...] * jnp.exp(m_prev - m_new) + jnp.sum(
            jnp.exp(x_lse - m_new), axis=-1, keepdims=True)
        t_ref[...] = t_ref[...] + tgt_part
        m_ref[...] = m_new

        @pl.when(j == n_col_tiles - 1)
        def _finish_row_tile():
            _accumulate(m_ref[...] + jnp.log(l_ref[...]) - t_ref[...])


def tag_line_loss(output: jax.Array, target: jax.Array, *,
                  block_rows: int | None = None,
                  block_cols: int | None = None) -> jax.Array:
    """Pallas equivalent of TagLineLoss.forward (CrossEntropyLoss, 'mean')."""
    assert output.ndim == 2, "expected logits of shape [N, C]"
    n, c = output.shape
    itemsize = jnp.dtype(output.dtype).itemsize
    sub = max(8, _SUBLANE_BYTES // itemsize)      # 8 f32, 16 bf16, 32 int8/fp8

    cap = _vmem_capacity_bytes()
    budget = min(cap // 2, 36 << 20)              # per-step VMEM working-set budget

    def per_row_bytes(tc_, split_):
        b = tc_ * (2 * itemsize + _F32_TEMP_BYTES)   # dbl-buffered native tile + f32 temps
        b += 2 * _ROWVEC_BYTES                        # dbl-buffered (tn, 1) int32 targets
        if split_:
            b += 3 * _ROWVEC_BYTES                    # m / l / target-logit row state
        return b

    # ---- class (lane) tiling: whole C when it fits, else online-logsumexp split.
    if block_cols is not None:
        tc = c if block_cols >= c else max(_LANE, (block_cols // _LANE) * _LANE)
    elif per_row_bytes(c, False) * sub <= budget:
        tc = c
    else:
        tc = max(_LANE,
                 ((budget // (sub * (2 * itemsize + _F32_TEMP_BYTES))) // _LANE) * _LANE)
    n_col_tiles = pl.cdiv(c, tc)
    split = n_col_tiles > 1

    # ---- row (sublane) tiling: byte-targeted off the working set, not a row cap.
    if block_rows is None:
        tn = max(sub, (budget // per_row_bytes(tc, split)) // sub * sub)
    else:
        tn = max(sub, _round_up(block_rows, sub))
    tn = min(tn, _round_up(n, sub))

    n_row_tiles = pl.cdiv(n, tn)
    # Leading "parallel" axis of independent partial sums: on v7x each TensorCore
    # streams half the batch; on 1-TC chips the partials just run back to back.
    n_parts = 2 if n_row_tiles >= 2 else 1
    row_tiles_per_part = pl.cdiv(n_row_tiles, n_parts)
    grid = (n_parts, row_tiles_per_part, n_col_tiles)

    def logits_map(p, i, j):
        return (jnp.minimum(p * row_tiles_per_part + i, n_row_tiles - 1), j)

    def target_map(p, i, j):
        return (jnp.minimum(p * row_tiles_per_part + i, n_row_tiles - 1), 0)

    def out_map(p, i, j):
        return (p, 0, 0)

    scratch_shapes = ([pltpu.VMEM((tn, 1), jnp.float32) for _ in range(3)]
                      if split else [])

    # VMEM limit from the f32 working set (not just native tile bytes).
    est = (2 * tn * tc * itemsize + tn * tc * _F32_TEMP_BYTES
           + 2 * tn * _ROWVEC_BYTES + (3 * tn * _ROWVEC_BYTES if split else 0)
           + 2 * 8 * _LANE * 4 + (2 << 20))
    vmem_limit = int(min(max(est, 8 << 20), max(cap - (8 << 20), 16 << 20)))

    kernel = functools.partial(
        _ce_loss_kernel, n_rows=n, n_cols=c, tile_rows=tn, tile_cols=tc,
        row_tiles_per_part=row_tiles_per_part, n_col_tiles=n_col_tiles)

    tgt = target.astype(jnp.int32).reshape(n, 1)

    partials = pl.pallas_call(
        kernel,
        out_shape=jax.ShapeDtypeStruct((n_parts, 8, _LANE), jnp.float32),
        grid_spec=pltpu.PrefetchScalarGridSpec(
            num_scalar_prefetch=0,
            grid=grid,
            in_specs=[
                pl.BlockSpec((tn, tc), logits_map),   # native-dtype logits tile
                pl.BlockSpec((tn, 1), target_map),    # int32 class indices
            ],
            out_specs=pl.BlockSpec((1, 8, _LANE), out_map),
            scratch_shapes=scratch_shapes,
        ),
        compiler_params=pltpu.CompilerParams(
            dimension_semantics=("parallel", "arbitrary", "arbitrary"),
            vmem_limit_bytes=vmem_limit,
        ),
    )(output, tgt)

    # TODO(synk): if profiling shows the single EUP (exp) slot binding on v6e/v7x with
    # bf16 logits, do the shifted exp in bf16 and keep only the accumulation in f32.
    return jnp.sum(partials[:, 0, 0]) / jnp.float32(n)


if __name__ == "__main__":
    key = jax.random.PRNGKey(0)

    def reference(logits, target):
        lg = logits.astype(jnp.float32)
        return jnp.mean(jax.nn.logsumexp(lg, axis=-1)
                        - jnp.take_along_axis(lg, target[:, None], axis=-1)[:, 0])

    configs = [
        # (N, C, dtype, block_rows, block_cols) -- small shapes, varied code paths
        (20, 32, jnp.float32, 8, None),       # ragged rows, 2 partials, clamped dup tile
        (64, 40, jnp.float32, None, None),    # auto byte-sized tiling, single tile, 1 partial
        (24, 200, jnp.bfloat16, 16, 128),     # bf16 + online-logsumexp class split, ragged C
    ]
    for (n, c, dt, br, bc) in configs:
        key, k_logits, k_target = jax.random.split(key, 3)
        logits = jax.random.normal(k_logits, (n, c), dtype=jnp.float32).astype(dt)
        target = jax.random.randint(k_target, (n,), 0, c, dtype=jnp.int32)

        loss = tag_line_loss(logits, target, block_rows=br, block_cols=bc)
        jax.block_until_ready(loss)

        ref = reference(logits, target)
        assert jnp.allclose(loss, ref, rtol=1e-4, atol=1e-4), (n, c, dt, loss, ref)

    print("KERNEL_OK")
</pallas_src>

<mosaic_0001>
module attributes {stable_mosaic.version = 11 : i64} {
  func.func @_ce_loss_kernel(%arg0: i32, %arg1: i32, %arg2: i32, %arg3: memref<8x32xf32, #tpu.memory_space<vmem>>, %arg4: memref<8x1xi32, #tpu.memory_space<vmem>>, %arg5: memref<1x8x128xf32, #tpu.memory_space<vmem>>) attributes {dimension_semantics = [#tpu.dimension_semantics<parallel>, #tpu.dimension_semantics<arbitrary>, #tpu.dimension_semantics<arbitrary>], iteration_bounds = array<i64: 2, 2, 1>, scalar_prefetch = 0 : i64, scratch_operands = 0 : i64, tpu.core_type = #tpu.core_type<tc>, window_params = [{transform_indices = @transform_0, window_bounds = array<i64: 8, 32>}, {transform_indices = @transform_1, window_bounds = array<i64: 8, 1>}, {transform_indices = @transform_2, window_bounds = array<i64: 1, 8, 128>}]} {
    %c0_i32 = arith.constant 0 : i32
    %0 = arith.cmpi eq, %arg1, %c0_i32 : i32
    %c0_i32_0 = arith.constant 0 : i32
    %1 = arith.cmpi eq, %arg2, %c0_i32_0 : i32
    %2 = arith.andi %0, %1 : i1
    %3 = arith.extui %2 : i1 to i32
    %c0_i32_1 = arith.constant 0 : i32
    %4 = arith.cmpi ne, %3, %c0_i32_1 : i32
    scf.if %4 {
      %cst_16 = arith.constant 0.000000e+00 : f32
      %45 = vector.broadcast %cst_16 : f32 to vector<1x8x128xf32>
      %c0_17 = arith.constant 0 : index
      %c0_18 = arith.constant 0 : index
      %c0_19 = arith.constant 0 : index
      %46 = vector.load %arg5[%c0_17, %c0_18, %c0_19] : memref<1x8x128xf32, #tpu.memory_space<vmem>>, vector<1x8x128xf32>
      tpu.vector_store %arg5[%c0_17, %c0_18, %c0_19], %45 {strides = array<i32>} : memref<1x8x128xf32, #tpu.memory_space<vmem>>, vector<1x8x128xf32>,
    } else {
    }
    %c2_i32 = arith.constant 2 : i32
    %5 = arith.muli %arg0, %c2_i32 : i32
    %6 = arith.addi %5, %arg1 : i32
    %c0 = arith.constant 0 : index
    %c0_2 = arith.constant 0 : index
    %7 = vector.load %arg3[%c0, %c0_2] : memref<8x32xf32, #tpu.memory_space<vmem>>, vector<8x32xf32>
    %c0_3 = arith.constant 0 : index
    %c0_4 = arith.constant 0 : index
    %8 = vector.load %arg4[%c0_3, %c0_4] : memref<8x1xi32, #tpu.memory_space<vmem>>, vector<8x1xi32>
    %c32_i32 = arith.constant 32 : i32
    %9 = arith.muli %c32_i32, %arg2 : i32
    %10 = tpu.iota {dimensions = array<i32: 1>} : vector<8x32xi32>
    %11 = vector.broadcast %9 : i32 to vector<8x32xi32>
    %12 = arith.addi %11, %10 : vector<8x32xi32>
    %13 = vector.broadcast %8 : vector<8x1xi32> to vector<8x32xi32>
    %14 = arith.cmpi eq, %12, %13 : vector<8x32xi32>
    %cst = arith.constant 0.000000e+00 : f32
    %15 = vector.broadcast %cst : f32 to vector<8x32xf32>
    %16 = arith.select %14, %7, %15 : vector<8x32xi1>, vector<8x32xf32>
    %cst_5 = arith.constant dense<0.000000e+00> : vector<8xf32>
    %17 = vector.multi_reduction <add>, %16, %cst_5 [1] : vector<8x32xf32> to vector<8xf32>
    %18 = vector.shape_cast %17 : vector<8xf32> to vector<8x1xf32>
    %cst_6 = arith.constant dense<0xFF800000> : vector<8xf32>
    %19 = vector.multi_reduction <maximumf>, %7, %cst_6 [1] : vector<8x32xf32> to vector<8xf32>
    %20 = vector.shape_cast %19 : vector<8xf32> to vector<8x1xf32>
    %21 = vector.broadcast %20 : vector<8x1xf32> to vector<8x32xf32>
    %22 = arith.subf %7, %21 : vector<8x32xf32>
    %23 = math.exp %22 : vector<8x32xf32>
    %cst_7 = arith.constant dense<0.000000e+00> : vector<8xf32>
    %24 = vector.multi_reduction <add>, %23, %cst_7 [1] : vector<8x32xf32> to vector<8xf32>
    %25 = vector.shape_cast %24 : vector<8xf32> to vector<8x1xf32>
    %26 = math.log %25 : vector<8x1xf32>
    %27 = arith.addf %20, %26 : vector<8x1xf32>
    %28 = arith.subf %27, %18 : vector<8x1xf32>
    %c8_i32 = arith.constant 8 : i32
    %29 = arith.muli %6, %c8_i32 : i32
    %30 = tpu.iota {dimensions = array<i32: 0>} : vector<8x1xi32>
    %31 = vector.broadcast %29 : i32 to vector<8x1xi32>
    %32 = arith.addi %31, %30 : vector<8x1xi32>
    %c20_i32 = arith.constant 20 : i32
    %33 = vector.broadcast %c20_i32 : i32 to vector<8x1xi32>
    %34 = arith.cmpi slt, %32, %33 : vector<8x1xi32>
    %cst_8 = arith.constant 0.000000e+00 : f32
    %35 = vector.broadcast %cst_8 : f32 to vector<8x1xf32>
    %36 = arith.select %34, %28, %35 : vector<8x1xi1>, vector<8x1xf32>
    %c0_9 = arith.constant 0 : index
    %c0_10 = arith.constant 0 : index
    %c0_11 = arith.constant 0 : index
    %37 = vector.load %arg5[%c0_9, %c0_10, %c0_11] : memref<1x8x128xf32, #tpu.memory_space<vmem>>, vector<1x8x128xf32>
    %38 = vector.shape_cast %36 : vector<8x1xf32> to vector<1x8x1xf32>
    %cst_12 = arith.constant dense<0.000000e+00> : vector<1xf32>
    %39 = vector.multi_reduction <add>, %38, %cst_12 [1, 2] : vector<1x8x1xf32> to vector<1xf32>
    %40 = vector.shape_cast %39 : vector<1xf32> to vector<1x1x1xf32>
    %41 = vector.extract %40[0, 0, 0] : f32 from vector<1x1x1xf32>
    %42 = vector.broadcast %41 : f32 to vector<1x8x128xf32>
    %43 = arith.addf %37, %42 : vector<1x8x128xf32>
    %c0_13 = arith.constant 0 : index
    %c0_14 = arith.constant 0 : index
    %c0_15 = arith.constant 0 : index
    %44 = vector.load %arg5[%c0_13, %c0_14, %c0_15] : memref<1x8x128xf32, #tpu.memory_space<vmem>>, vector<1x8x128xf32>
    tpu.vector_store %arg5[%c0_13, %c0_14, %c0_15], %43 {strides = array<i32>} : memref<1x8x128xf32, #tpu.memory_space<vmem>>, vector<1x8x128xf32>,
    return
  }
  func.func @transform_0(%arg0: i32, %arg1: i32, %arg2: i32) -> (i32, i32) {
    %c2_i32 = arith.constant 2 : i32
    %0 = arith.muli %arg0, %c2_i32 : i32
    %1 = arith.addi %0, %arg1 : i32
    %c2_i32_0 = arith.constant 2 : i32
    %2 = arith.minsi %1, %c2_i32_0 : i32
    %c0_i32 = arith.constant 0 : i32
    return %2, %arg2 : i32, i32
  }
  func.func @transform_1(%arg0: i32, %arg1: i32, %arg2: i32) -> (i32, i32) {
    %c2_i32 = arith.constant 2 : i32
    %0 = arith.muli %arg0, %c2_i32 : i32
    %1 = arith.addi %0, %arg1 : i32
    %c2_i32_0 = arith.constant 2 : i32
    %2 = arith.minsi %1, %c2_i32_0 : i32
    %c0_i32 = arith.constant 0 : i32
    %c0_i32_1 = arith.constant 0 : i32
    return %2, %c0_i32 : i32, i32
  }
  func.func @transform_2(%arg0: i32, %arg1: i32, %arg2: i32) -> (i32, i32, i32) {
    %c0_i32 = arith.constant 0 : i32
    %c0_i32_0 = arith.constant 0 : i32
    %c0_i32_1 = arith.constant 0 : i32
    return %arg0, %c0_i32, %c0_i32_0 : i32, i32, i32
  }
}

</mosaic_0001>

<bundles_post_ra>
// kernel: tpu_custom_call.1
= control target key start
LH: loop header
LB: loop body
LE: loop exit
PB: predicated region body
PF: predicated region fallthrough
CT: control target
= control target key end

     0   :  { %7 = vsyncpa [#allocation3], 0  ;;  %s780_s0 = inlined_call_operand.vmem [shape: f32[20,32], index: 0, kind: input, shape index: {}]   ;;  %s781_s1 = inlined_call_operand.vmem [shape: s32[20,1], index: 1, kind: input, shape index: {}]   ;;  %s782_s2 = inlined_call_operand.hbm [shape: f32[2,8,128], index: 2, kind: output, shape index: {}]  }
   0x1   :  { %9 = vsyncpa [#allocation3 + $0x1], 0  ;;  %s626_s9 = smov 0   ;;  %s628_s10 = smov 0  }
   0x2   :  { %s630_s11 = smov 0   ;;  %s632_s12 = smov 0  }
   0x3   :  { %s634_s13 = smov 0   ;;  %s636_s14 = smov 0  }
   0x4   :  { %s638_s15 = smov 0   ;;  %s640_s16 = smov 0  }
   0x5 LB: > { %s404_s17 = sadd.s32 4294967295, %s606_s16   ;;  %s405_s18 = sadd.s32 4294967294, %s606_s16   ;;  %s606_s16 = sphi %s640_s16, %s15_s16   ;;  %s602_s15 = sphi %s638_s15, %s791_s15   ;;  %s598_s14 = sphi %s636_s14, %s790_s14   ;;  %s594_s13 = sphi %s634_s13, %s789_s13   ;;  %s590_s12 = sphi %s632_s12, %s788_s12   ;;  %s586_s11 = sphi %s630_s11, %s787_s11   ;;  %s582_s10 = sphi %s628_s10, %s786_s10   ;;  %s578_s9 = sphi %s626_s9, %s785_s9  }
   0x6   : > { %s30_s19 = sadd.s32 1, %s598_s14  ;;  %s34_s20 = sadd.s32 1, %s602_s15 }
   0x7   : > { %p32_p0 = scmp.ge.s32.totalorder %s30_s19, 2  ;;  %p121_p1 = scmp.ne.s32.totalorder %s586_s11, %s582_s10 }
   0x8   : > { %p122_p2 = scmp.eq.s32.totalorder %s404_s17, 3  ;;  %p127_p4 = scmp.ne.s32.totalorder %s582_s10, %s578_s9 }
   0x9   : > { %s793_s19 = smov (%p32_p0, %s30_s19), 0  ;;  %s795_s20 = smov (!%p32_p0, %s34_s20), %s602_s15 }
   0xa   : > { %p675_p3 = por %p122_p2, %p121_p1  ;;  %p36_p5 = scmp.ge.s32.totalorder %s795_s20, 2 }
   0xb   : > { %p128_p6 = scmp.eq.s32.totalorder %s405_s18, 3  ;;  %p412_p7 = scmp.ge.s32.totalorder %s606_s16, 1 }
   0xc   : > { %p179_p8 = scmp.lt.s32.totalorder %s606_s16, 5  ;;  %s797_s20 = smov (%p36_p5, %s795_s20), 0 }
   0xd   : > { %p685_p9 = por %p128_p6, %p127_p4  ;;  %s108_s23 = ssub.s32 %s602_s15, %s797_s20 }
   0xe   : > { %p180_p10 = pnand %p412_p7, %p179_p8  ;;  %s111_s24 = sadd.s32 1, %s586_s11 }
   0xf   : > { %p109_p11 = scmp.eq.s32.totalorder %s108_s23, 0  ;;  %s212_s26 = sand.u32 (!%p180_p10), 1, %s582_s10  }
  0x10   : > { %183 = sbr.rel (%p180_p10) target bundleno = 573 (0x23d), region = 28  ;;  %s414_s27 = sshll.u32 (!%p180_p10), %s594_s13, 1 }
  0x11   : > { %s693_s25 = scalar_select %p109_p11, %s586_s11, %s111_s24  }
  0x12   : > { %s413_s28 = sshll.u32 (!%p180_p10), %s212_s26, 3  ;;  %s700_s29 = sadd.s32 (!%p180_p10), %s590_s12, %s414_s27 }
  0x13   : > { %p217_p12 = scmp.lt.s32.totalorder (!%p180_p10), %s700_s29, 2  ;;  %p242_p13 = scmp.eq.s32.totalorder (!%p180_p10), %s590_s12, 0 }
  0x14   : > { %s711_s18 = scalar_lea.vmem (!%p180_p10), [#allocation2], %s413_s28 }
  0x17   : > { %s218_s30 = scalar_select %p217_p12, %s700_s29, 2 }
  0x18   : > { %247 = sbr.rel (!%p242_p13) target bundleno = 31 (0x1f), region = 32  ;;  %v608_v0 = vmov (%p242_p13), 0.0  }
  0x19   : > { %s799_s30 = smov (!%p217_p12, %s218_s30), 2  ;;  %248 = vst [vmem:[%s711_s18] sm:$0xff] (%p242_p13), %v608_v0 }
  0x1a   : > { %s418_s3 = sshll.u32 %s799_s30, 3 }
  0x1b   : > { %s225_s6 = scalar_lea.vmem %s780_s0, %s418_s3  ;;  %s237_s17 = scalar_lea.vmem %s781_s1, %s418_s3 }
  0x1f PF: > { %v251_v1 = vld [vmem:[%s225_s6] sm:$0xff]  ;;  %vm263_vm0 = vcmask 261120   ;;  %v609_v3 = vmov 0   ;;  %v254_v8 = vlaneseq  ;;  %s426_s12 = sshll.u32 %s700_s29, 3  ;;  %vm288_vm3 = vcmask 7168   ;;  %s428_s23 = sshll.u32 %s594_s13, 7 }
  0x20   : > { %v267_v2 = vsel %vm263_vm0, %v251_v1, -inf  ;;  %507 = vset.pattern.permute.xlu0 %v609_v3  ;;  %v252_v4 = vld [vmem:[%s237_s17] sm:$0xff]  ;;  %v283_v17 = vstv %s426_s12  ;;  %s316_s24 = sshll.u32 %s711_s18, 4  ;;  %s724_s30 = scalar_lea.hbm %s782_s2, %s428_s23  ;;  %s726_s24 = int_to_ptr.vmem [resolvable:$true] %s316_s24 }
  0x21   : > { %268 = vmax.xlane.f32.xlu0 %v267_v2  ;;  %v255_v9 = vand.u32 127, %v254_v8  ;;  %v282_v16 = vshrl.u32 %v254_v8, 7  ;;  %v287_v33 = vld [vmem:[%s711_s18] sm:$0xff]  ;;  %s303_s3 = scalar_lea.sflag [#allocation3], %s212_s26  ;;  %s512_s4 = scalar_lea.vmem %s726_s24, 128 }
  0x22   : > { %p513_p0 = scmp.ne.s32.totalorder %s726_s24, %s512_s4  ;;  %s610_s13 = smov [#allocation2]  }
  0x23   : > { %v284_v19 = vadd.s32 %v283_v17, %v282_v16  ;;  %s516_s5 = sshll.u32 %s610_s13, 4  ;;  %s517_s5 = int_to_ptr.vmem [resolvable:$false] %s516_s5 }
  0x24   : > { %p514_p1 = pnand %p513_p0, %p675_p3  ;;  %s518_s6 = scalar_lea.vmem %s517_s5, 256 }
  0x25   : > { %vm285_vm2 = vcmp.lt.s32.totalorder %v284_v19, 20  ;;  %p519_p4 = scmp.lt.s32.totalorder %s726_s24, %s517_s5  ;;  %p520_p5 = scmp.lt.s32.totalorder %s518_s6, %s512_s4 }
  0x26   : > { %p515_p2 = pneg %p514_p1 }
  0x27   : > { %p521_p6 = por %p520_p5, %p519_p4 }
  0x29   : > { %p522_p7 = pnand %p521_p6, %p515_p2 }
  0x37   : > { %259 = vperm.xlu0 %507, %v252_v4  }
  0xae   : > { %v269_v5 = vpop.xlane.xlu0 %268 }
  0xaf   : > { %v270_v6 = vsub.f32 %v251_v1, %v269_v5 }
  0xb1   : > { %v271_v7 = vmul.f32 1.442695, %v270_v6 }
  0xb3   : > { %508 = vpow2.f32 %v271_v7 }
  0xb6   : > { %v260_v10 = vpop.permute.xlu0 %259 }
  0xb7   : > { %vm261_vm1 = vcmp.eq.s32.totalorder %v255_v9, %v260_v10 }
  0xb8   : > { %v262_v12 = vsel %vm261_vm1, %v251_v1, 0.0 }
  0xb9   : > { %v264_v14 = vsel %vm263_vm0, %v262_v12, 0.0 }
  0xbd   : > { %v509_v11 = vpop.eup %508 }
  0xbe   : > { %v273_v13 = vsel %vm263_vm0, %v509_v11, 0.0 }
  0xbf   : > { %274 = vadd.xlane.f32.xlu1 %v273_v13 }
  0xc3   : > { %265 = vadd.xlane.f32.xlu1 %v264_v14 }
 0x14c   : > { %v275_v15 = vpop.xlane.xlu1 %274 }
 0x14d   : > { %510 = vlog2.f32 %v275_v15 }
 0x150   : > { %v266_v21 = vpop.xlane.xlu1 %265 }
 0x157   : > { %v511_v18 = vpop.eup %510 }
 0x158   : > { %v277_v20 = vmul.f32 0.6931472, %v511_v18 }
 0x15a   : > { %v278_v22 = vadd.f32 %v277_v20, %v269_v5 }
 0x15c   : > { %v279_v23 = vsub.f32 %v278_v22, %v266_v21 }
 0x15e   : > { %v286_v24 = vsel %vm285_vm2, %v279_v23, 0.0 }
 0x15f   : > { %v289_v25 = vsel %vm288_vm3, %v286_v24, 0.0 }
 0x160   : > { %290 = vadd.xlane.f32.xlu1 %v289_v25 }
 0x1ed   : > { %v291_v26 = vpop.xlane.xlu1 %290 }
 0x1ee   : > { %v292_v27 = vrot.slane %v291_v26, 4 }
 0x1f0   : > { %v293_v28 = vadd.f32 %v292_v27, %v291_v26 }
 0x1f2   : > { %v294_v29 = vrot.slane %v293_v28, 2 }
 0x1f4   : > { %v295_v30 = vadd.f32 %v294_v29, %v293_v28 }
 0x1f6   : > { %v296_v31 = vrot.slane %v295_v30, 1 }
 0x1f8   : > { %v297_v32 = vadd.f32 %v296_v31, %v295_v30 }
 0x1fa   : > { %432 = vpush %v297_v32 }
 0x22b   : > { %s433_s27 = spop %432 }
 0x22c   : > { %v299_v34 = vstv %s433_s27 }
 0x22d   : > { %v300_v35 = vadd.f32 %v299_v34, %v287_v33 }
 0x22f   : > { %301 = vst [vmem:[%s711_s18] sm:$0xff] %v300_v35 }
 0x230   : > { %525 = shalt.err (!%p522_p7)
}
 0x231   : > { %s526_s26 = scalar_lea.hbm %s724_s30, 128  ;;  %s530_s17 = scalar_lea.hbm %s782_s2, 256 }
 0x232   : > { %p527_p8 = scmp.ne.s32.totalorder %s724_s30, %s526_s26  ;;  %p531_p12 = scmp.lt.u32.totalorder %s724_s30, %s782_s2 }
 0x233   : > { %p532_p13 = scmp.lt.u32.totalorder %s530_s17, %s526_s26  ;;  %p534_p1 = scmp.lt.u32.totalorder %s526_s26, %s724_s30 }
 0x234   : > { %p528_p10 = pnand %p527_p8, %p675_p3 }
 0x235   : > { %p533_p0 = por %p532_p13, %p531_p12 }
 0x236   : > { %p529_p11 = pneg %p528_p10 }
 0x237   : > { %p535_p2 = por %p534_p1, %p533_p0 }
 0x239   : > { %p536_p4 = pnand %p535_p2, %p529_p11 }
 0x23b   : > { %539 = shalt.err (!%p536_p4)
}
 0x23c   : > { %434 = dma.vmem_to_hbm [thread:$0]  (%p675_p3), %s726_s24, 128, %s724_s30, %s303_s3  }
 0x23d PF: > { %p440_p5 = scmp.ge.s32.totalorder %s606_s16, 2  ;;  %s328_s23 = sand.u32 1, %s578_s9  }
 0x23e   : > { %s329_s27 = scalar_lea.sflag [#allocation3], %s328_s23 }
 0x23f   : > { %p437_p6 = pnand %p440_p5, %p685_p9 }
 0x241   : > { %573 = dma.done.wait (!%p437_p6), %s329_s27, 128  }
 0x242   : > { %575 = vsyncadd (!%p437_p6), %s329_s27, 4294967168  ;;  %s15_s16 = sadd.s32 1, %s606_s16   ;;  %s785_s9 = smov %s582_s10 }
 0x243   : > { %p12_p7 = scmp.ge.s32.totalorder %s15_s16, 6   ;;  %s786_s10 = smov %s586_s11 }
 0x244   : > { %s787_s11 = smov %s693_s25  ;;  %s788_s12 = smov %s598_s14 }
 0x245   : > { %s789_s13 = smov %s602_s15  ;;  %s790_s14 = smov %s793_s19 }
 0x246   : > { %s791_s15 = smov %s797_s20  ;;  %14 = sbr.rel (!%p12_p7) target bundleno = 5 (0x5), region = 70 }
 0x24d   :  { %334 = vsyncpa [#allocation3], 1 }
 0x24e   :  { %336 = vsyncpa [#allocation3 + $0x1], 1 }

</bundles_post_ra>
